<compile_context>
chip_gen: v7x
topology: tpu7x:2x2x1
jax: 0.10.0
libtpu: 0.0.40
codegen_flags: <defaults>
</compile_context>

<pallas_src>
import jax
import jax.numpy as jnp
import numpy as np
from jax.experimental import pallas as pl
from jax.experimental.pallas import tpu as pltpu

# Feature sizes from the module definition.
D_IN, D1, D2, D3, D_OUT = 30, 40, 50, 60, 1
BATCH_TILE = 8192   # default batch tile (lanes); multiple of 128
LANE = 128


def _cdiv(a, b):
    return -(-a // b)


def _round_up(a, b):
    return _cdiv(a, b) * b


def ann_kernel(xt_ref, w1_ref, b1_ref, w2_ref, b2_ref, w3_ref, b3_ref,
               w4_ref, b4_ref, o_ref):
    # xt_ref: (D_IN, BT) bf16 tile -- features on sublanes, batch on lanes.
    x = xt_ref[...]

    # Layer 1: (40,30)bf16 @ (30,BT)bf16 -> (40,BT) f32 acc; bias/ReLU in f32.
    h = jnp.dot(w1_ref[...], x, preferred_element_type=jnp.float32) + b1_ref[...]
    h = jnp.maximum(h, 0.0)

    # Layer 2: (50,40) @ (40,BT) -> (50,BT)
    h = jnp.dot(w2_ref[...], h.astype(jnp.bfloat16),
                preferred_element_type=jnp.float32) + b2_ref[...]
    h = jnp.maximum(h, 0.0)

    # Layer 3: (60,50) @ (50,BT) -> (60,BT)
    h = jnp.dot(w3_ref[...], h.astype(jnp.bfloat16),
                preferred_element_type=jnp.float32) + b3_ref[...]
    h = jnp.maximum(h, 0.0)

    # Layer 4: (1,60) @ (60,BT) -> (1,BT)  lane-dense output row.
    out = jnp.dot(w4_ref[...], h.astype(jnp.bfloat16),
                  preferred_element_type=jnp.float32) + b4_ref[...]
    o_ref[...] = out.astype(o_ref.dtype)


def _pick_tile(b, batch_tile):
    """Choose a lane-aligned batch tile; force >=2 grid steps for big batches
    so the parallel axis can shard across v7x's two TensorCores."""
    bt = max(LANE, min(_round_up(batch_tile, LANE), _round_up(b, LANE)))
    if b > 2 * LANE and _cdiv(b, bt) < 2:
        bt = _round_up(_cdiv(b, 2), LANE)
    return bt


def ann_forward(x, params, *, batch_tile=BATCH_TILE):
    """x: (B, ...) flattened to (B, 30). Returns (B, 1) float32."""
    b = x.shape[0]
    x2 = x.reshape(b, -1)  # nn.Flatten
    assert x2.shape[1] == D_IN, f"expected flattened dim {D_IN}, got {x2.shape[1]}"

    bt = _pick_tile(b, batch_tile)
    num_tiles = _cdiv(b, bt)
    b_pad = num_tiles * bt

    # Single fused XLA pass: transpose to (D_IN, B) and cast to bf16 for streaming.
    xt = x2.T.astype(jnp.bfloat16)
    if b_pad != b:
        xt = jnp.pad(xt, ((0, 0), (0, b_pad - b)))  # zero-pad odd batch sizes

    w1, b1, w2, b2, w3, b3, w4, b4 = params

    def full_spec(shape):
        # Weights/biases are tiny: whole-array blocks, resident every step.
        return pl.BlockSpec(shape, lambda i: (0, 0))

    out_row = pl.pallas_call(
        ann_kernel,
        out_shape=jax.ShapeDtypeStruct((1, b_pad), jnp.float32),
        grid=(num_tiles,),
        in_specs=[
            pl.BlockSpec((D_IN, bt), lambda i: (0, i)),  # streamed bf16 input
            full_spec(w1.shape), full_spec(b1.shape),
            full_spec(w2.shape), full_spec(b2.shape),
            full_spec(w3.shape), full_spec(b3.shape),
            full_spec(w4.shape), full_spec(b4.shape),
        ],
        out_specs=pl.BlockSpec((1, bt), lambda i: (0, i)),
        compiler_params=pltpu.CompilerParams(
            dimension_semantics=("parallel",),
            vmem_limit_bytes=32 * 1024 * 1024),
    )(xt, w1, b1, w2, b2, w3, b3, w4, b4)

    # (1, b_pad) lane-dense slab -> (B, 1) column, dropping padded entries.
    return out_row.reshape(b_pad, 1)[:b]


def init_params(key):
    """Deterministic init mimicking PyTorch Linear (uniform +-1/sqrt(fan_in)).
    Weights in PyTorch (out_features, in_features) layout cast to bf16 for the
    MXU; biases kept f32 as (out_features, 1) columns (broadcast along lanes)."""
    dims = [(D_IN, D1), (D1, D2), (D2, D3), (D3, D_OUT)]
    params = []
    for i, (fan_in, fan_out) in enumerate(dims):
        kw, kb = jax.random.split(jax.random.fold_in(key, i))
        bound = 1.0 / np.sqrt(fan_in)
        w = jax.random.uniform(kw, (fan_out, fan_in), jnp.float32, -bound, bound)
        bvec = jax.random.uniform(kb, (fan_out, 1), jnp.float32, -bound, bound)
        params += [w.astype(jnp.bfloat16), bvec]
    return tuple(params)


def ann_reference(x, params):
    """Pure-JAX reference mirroring the kernel's numerics (bf16 operands,
    f32 accumulation / bias / ReLU)."""
    b = x.shape[0]
    w1, b1, w2, b2, w3, b3, w4, b4 = params
    h = x.reshape(b, -1).astype(jnp.bfloat16)
    h = jnp.maximum(jnp.dot(h, w1.T, preferred_element_type=jnp.float32) + b1[:, 0], 0.0)
    h = jnp.maximum(jnp.dot(h.astype(jnp.bfloat16), w2.T,
                            preferred_element_type=jnp.float32) + b2[:, 0], 0.0)
    h = jnp.maximum(jnp.dot(h.astype(jnp.bfloat16), w3.T,
                            preferred_element_type=jnp.float32) + b3[:, 0], 0.0)
    return jnp.dot(h.astype(jnp.bfloat16), w4.T,
                   preferred_element_type=jnp.float32) + b4[:, 0]


if __name__ == "__main__":
    key = jax.random.PRNGKey(0)
    k_params, k_x, k_x2 = jax.random.split(key, 3)

    params = init_params(k_params)

    # Small batch, multi-dim input to exercise nn.Flatten (5*6 = 30 features).
    B = 16
    x = jax.random.normal(k_x, (B, 5, 6), jnp.float32)
    out = jax.block_until_ready(ann_forward(x, params))
    ref = ann_reference(x, params)
    np.testing.assert_allclose(np.asarray(out), np.asarray(ref),
                               rtol=5e-3, atol=5e-3)
    assert out.shape == (B, 1)

    # Odd batch size: exercises tile rounding + zero-padding + multiple grid steps.
    B2 = 1030
    x2 = jax.random.normal(k_x2, (B2, D_IN), jnp.float32)
    out2 = jax.block_until_ready(ann_forward(x2, params, batch_tile=512))
    ref2 = ann_reference(x2, params)
    np.testing.assert_allclose(np.asarray(out2), np.asarray(ref2),
                               rtol=5e-3, atol=5e-3)
    assert out2.shape == (B2, 1)

    print("KERNEL_OK")
</pallas_src>

<mosaic_0001>
module attributes {stable_mosaic.version = 11 : i64} {
  func.func @ann_kernel(%arg0: i32, %arg1: memref<30x128xbf16, #tpu.memory_space<vmem>>, %arg2: memref<40x30xbf16, #tpu.memory_space<vmem>>, %arg3: memref<40x1xf32, #tpu.memory_space<vmem>>, %arg4: memref<50x40xbf16, #tpu.memory_space<vmem>>, %arg5: memref<50x1xf32, #tpu.memory_space<vmem>>, %arg6: memref<60x50xbf16, #tpu.memory_space<vmem>>, %arg7: memref<60x1xf32, #tpu.memory_space<vmem>>, %arg8: memref<1x60xbf16, #tpu.memory_space<vmem>>, %arg9: memref<1x1xf32, #tpu.memory_space<vmem>>, %arg10: memref<1x128xf32, #tpu.memory_space<vmem>>) attributes {dimension_semantics = [#tpu.dimension_semantics<parallel>], iteration_bounds = array<i64: 1>, scalar_prefetch = 0 : i64, scratch_operands = 0 : i64, tpu.core_type = #tpu.core_type<tc>, window_params = [{transform_indices = @transform_0, window_bounds = array<i64: 30, 128>}, {pipeline_mode = #tpu.pipeline_mode<synchronous>, transform_indices = @transform_1, window_bounds = array<i64: 40, 30>}, {pipeline_mode = #tpu.pipeline_mode<synchronous>, transform_indices = @transform_2, window_bounds = array<i64: 40, 1>}, {pipeline_mode = #tpu.pipeline_mode<synchronous>, transform_indices = @transform_3, window_bounds = array<i64: 50, 40>}, {pipeline_mode = #tpu.pipeline_mode<synchronous>, transform_indices = @transform_4, window_bounds = array<i64: 50, 1>}, {pipeline_mode = #tpu.pipeline_mode<synchronous>, transform_indices = @transform_5, window_bounds = array<i64: 60, 50>}, {pipeline_mode = #tpu.pipeline_mode<synchronous>, transform_indices = @transform_6, window_bounds = array<i64: 60, 1>}, {pipeline_mode = #tpu.pipeline_mode<synchronous>, transform_indices = @transform_7, window_bounds = array<i64: 1, 60>}, {pipeline_mode = #tpu.pipeline_mode<synchronous>, transform_indices = @transform_8, window_bounds = array<i64: 1, 1>}, {transform_indices = @transform_9, window_bounds = array<i64: 1, 128>}]} {
    %c0 = arith.constant 0 : index
    %c0_0 = arith.constant 0 : index
    %0 = vector.load %arg1[%c0, %c0_0] : memref<30x128xbf16, #tpu.memory_space<vmem>>, vector<30x128xbf16>
    %c0_1 = arith.constant 0 : index
    %c0_2 = arith.constant 0 : index
    %1 = vector.load %arg2[%c0_1, %c0_2] : memref<40x30xbf16, #tpu.memory_space<vmem>>, vector<40x30xbf16>
    %cst = arith.constant dense<0.000000e+00> : vector<40x128xf32>
    %2 = tpu.matmul %1, %0, %cst {dimension_numbers = #tpu.dot_dimension_numbers<[1], [0], [0], [1], [0, 0, 1, 1], [], []>} : vector<40x30xbf16>, vector<30x128xbf16>, vector<40x128xf32> -> vector<40x128xf32>
    %c0_3 = arith.constant 0 : index
    %c0_4 = arith.constant 0 : index
    %3 = vector.load %arg3[%c0_3, %c0_4] : memref<40x1xf32, #tpu.memory_space<vmem>>, vector<40x1xf32>
    %4 = vector.broadcast %3 : vector<40x1xf32> to vector<40x128xf32>
    %5 = arith.addf %2, %4 : vector<40x128xf32>
    %cst_5 = arith.constant 0.000000e+00 : f32
    %6 = vector.broadcast %cst_5 : f32 to vector<40x128xf32>
    %7 = arith.maximumf %5, %6 : vector<40x128xf32>
    %c0_6 = arith.constant 0 : index
    %c0_7 = arith.constant 0 : index
    %8 = vector.load %arg4[%c0_6, %c0_7] : memref<50x40xbf16, #tpu.memory_space<vmem>>, vector<50x40xbf16>
    %9 = arith.truncf %7 : vector<40x128xf32> to vector<40x128xbf16>
    %cst_8 = arith.constant dense<0.000000e+00> : vector<50x128xf32>
    %10 = tpu.matmul %8, %9, %cst_8 {dimension_numbers = #tpu.dot_dimension_numbers<[1], [0], [0], [1], [0, 0, 1, 1], [], []>} : vector<50x40xbf16>, vector<40x128xbf16>, vector<50x128xf32> -> vector<50x128xf32>
    %c0_9 = arith.constant 0 : index
    %c0_10 = arith.constant 0 : index
    %11 = vector.load %arg5[%c0_9, %c0_10] : memref<50x1xf32, #tpu.memory_space<vmem>>, vector<50x1xf32>
    %12 = vector.broadcast %11 : vector<50x1xf32> to vector<50x128xf32>
    %13 = arith.addf %10, %12 : vector<50x128xf32>
    %cst_11 = arith.constant 0.000000e+00 : f32
    %14 = vector.broadcast %cst_11 : f32 to vector<50x128xf32>
    %15 = arith.maximumf %13, %14 : vector<50x128xf32>
    %c0_12 = arith.constant 0 : index
    %c0_13 = arith.constant 0 : index
    %16 = vector.load %arg6[%c0_12, %c0_13] : memref<60x50xbf16, #tpu.memory_space<vmem>>, vector<60x50xbf16>
    %17 = arith.truncf %15 : vector<50x128xf32> to vector<50x128xbf16>
    %cst_14 = arith.constant dense<0.000000e+00> : vector<60x128xf32>
    %18 = tpu.matmul %16, %17, %cst_14 {dimension_numbers = #tpu.dot_dimension_numbers<[1], [0], [0], [1], [0, 0, 1, 1], [], []>} : vector<60x50xbf16>, vector<50x128xbf16>, vector<60x128xf32> -> vector<60x128xf32>
    %c0_15 = arith.constant 0 : index
    %c0_16 = arith.constant 0 : index
    %19 = vector.load %arg7[%c0_15, %c0_16] : memref<60x1xf32, #tpu.memory_space<vmem>>, vector<60x1xf32>
    %20 = vector.broadcast %19 : vector<60x1xf32> to vector<60x128xf32>
    %21 = arith.addf %18, %20 : vector<60x128xf32>
    %cst_17 = arith.constant 0.000000e+00 : f32
    %22 = vector.broadcast %cst_17 : f32 to vector<60x128xf32>
    %23 = arith.maximumf %21, %22 : vector<60x128xf32>
    %c0_18 = arith.constant 0 : index
    %c0_19 = arith.constant 0 : index
    %24 = vector.load %arg8[%c0_18, %c0_19] : memref<1x60xbf16, #tpu.memory_space<vmem>>, vector<1x60xbf16>
    %25 = arith.truncf %23 : vector<60x128xf32> to vector<60x128xbf16>
    %cst_20 = arith.constant dense<0.000000e+00> : vector<1x128xf32>
    %26 = tpu.matmul %24, %25, %cst_20 {dimension_numbers = #tpu.dot_dimension_numbers<[1], [0], [0], [1], [0, 0, 1, 1], [], []>} : vector<1x60xbf16>, vector<60x128xbf16>, vector<1x128xf32> -> vector<1x128xf32>
    %c0_21 = arith.constant 0 : index
    %c0_22 = arith.constant 0 : index
    %27 = vector.load %arg9[%c0_21, %c0_22] : memref<1x1xf32, #tpu.memory_space<vmem>>, vector<1x1xf32>
    %28 = vector.broadcast %27 : vector<1x1xf32> to vector<1x128xf32>
    %29 = arith.addf %26, %28 : vector<1x128xf32>
    %c0_23 = arith.constant 0 : index
    %c0_24 = arith.constant 0 : index
    %30 = vector.load %arg10[%c0_23, %c0_24] : memref<1x128xf32, #tpu.memory_space<vmem>>, vector<1x128xf32>
    tpu.vector_store %arg10[%c0_23, %c0_24], %29 {strides = array<i32>} : memref<1x128xf32, #tpu.memory_space<vmem>>, vector<1x128xf32>,
    return
  }
  func.func @transform_0(%arg0: i32) -> (i32, i32) {
    %c0_i32 = arith.constant 0 : i32
    %c0_i32_0 = arith.constant 0 : i32
    return %c0_i32, %arg0 : i32, i32
  }
  func.func @transform_1(%arg0: i32) -> (i32, i32) {
    %c0_i32 = arith.constant 0 : i32
    %c0_i32_0 = arith.constant 0 : i32
    %c0_i32_1 = arith.constant 0 : i32
    return %c0_i32, %c0_i32_0 : i32, i32
  }
  func.func @transform_2(%arg0: i32) -> (i32, i32) {
    %c0_i32 = arith.constant 0 : i32
    %c0_i32_0 = arith.constant 0 : i32
    %c0_i32_1 = arith.constant 0 : i32
    return %c0_i32, %c0_i32_0 : i32, i32
  }
  func.func @transform_3(%arg0: i32) -> (i32, i32) {
    %c0_i32 = arith.constant 0 : i32
    %c0_i32_0 = arith.constant 0 : i32
    %c0_i32_1 = arith.constant 0 : i32
    return %c0_i32, %c0_i32_0 : i32, i32
  }
  func.func @transform_4(%arg0: i32) -> (i32, i32) {
    %c0_i32 = arith.constant 0 : i32
    %c0_i32_0 = arith.constant 0 : i32
    %c0_i32_1 = arith.constant 0 : i32
    return %c0_i32, %c0_i32_0 : i32, i32
  }
  func.func @transform_5(%arg0: i32) -> (i32, i32) {
    %c0_i32 = arith.constant 0 : i32
    %c0_i32_0 = arith.constant 0 : i32
    %c0_i32_1 = arith.constant 0 : i32
    return %c0_i32, %c0_i32_0 : i32, i32
  }
  func.func @transform_6(%arg0: i32) -> (i32, i32) {
    %c0_i32 = arith.constant 0 : i32
    %c0_i32_0 = arith.constant 0 : i32
    %c0_i32_1 = arith.constant 0 : i32
    return %c0_i32, %c0_i32_0 : i32, i32
  }
  func.func @transform_7(%arg0: i32) -> (i32, i32) {
    %c0_i32 = arith.constant 0 : i32
    %c0_i32_0 = arith.constant 0 : i32
    %c0_i32_1 = arith.constant 0 : i32
    return %c0_i32, %c0_i32_0 : i32, i32
  }
  func.func @transform_8(%arg0: i32) -> (i32, i32) {
    %c0_i32 = arith.constant 0 : i32
    %c0_i32_0 = arith.constant 0 : i32
    %c0_i32_1 = arith.constant 0 : i32
    return %c0_i32, %c0_i32_0 : i32, i32
  }
  func.func @transform_9(%arg0: i32) -> (i32, i32) {
    %c0_i32 = arith.constant 0 : i32
    %c0_i32_0 = arith.constant 0 : i32
    return %c0_i32, %arg0 : i32, i32
  }
}

</mosaic_0001>

<bundles_post_ra>
// kernel: tpu_custom_call.1
= control target key start
LH: loop header
LB: loop body
LE: loop exit
PB: predicated region body
PF: predicated region fallthrough
CT: control target
= control target key end

     0   :  { %s929_s0 = inlined_call_operand.vmem [shape: bf16[30,128], index: 0, kind: input, shape index: {}]   ;;  %s930_s1 = inlined_call_operand.vmem [shape: bf16[40,30], index: 1, kind: input, shape index: {}]   ;;  %s931_s2 = inlined_call_operand.vmem [shape: f32[40,1], index: 2, kind: input, shape index: {}]   ;;  %s932_s3 = inlined_call_operand.vmem [shape: bf16[50,40], index: 3, kind: input, shape index: {}]   ;;  %s933_s4 = inlined_call_operand.vmem [shape: f32[50,1], index: 4, kind: input, shape index: {}]   ;;  %s934_s5 = inlined_call_operand.vmem [shape: bf16[60,50], index: 5, kind: input, shape index: {}]   ;;  %s935_s6 = inlined_call_operand.vmem [shape: f32[60,1], index: 6, kind: input, shape index: {}]   ;;  %s936_s7 = inlined_call_operand.vmem [shape: bf16[1,60], index: 7, kind: input, shape index: {}]   ;;  %s937_s8 = inlined_call_operand.<no memory space> [shape: f32[1,1], index: 8, kind: input, shape index: {}]   ;;  %s938_s9 = inlined_call_operand.hbm [shape: f32[1,128], index: 9, kind: output, shape index: {}]  }
   0x1   :  { %v14_v0 = vstv %s937_s8 }
   0x2   :  { %15 = vst [vmem:[#allocation2] sm:$0x1] %v14_v0 }
   0x3   :  { %v696_v1 = vld [vmem:[%s929_s0] sm:$0xff]   ;;  %v733_v2 = vmov 0.0   ;;  %v697_v3 = vld [vmem:[%s929_s0 + $0x8] sm:$0x7f]   ;;  %vm109_vm0 = vcmask 1046528   ;;  %vm734_vm1 = vmmov 0  }
   0x4   :  { %630 = vmatprep.subr.bf16.mxu0 %v733_v2  ;;  %v111_v4 = vsel %vm109_vm0, %v697_v3, 0  ;;  %634 = vmatprep.mubr.msk.bf16.mxu0 %vm734_vm1, %v733_v2  ;;  %v698_v5 = vld [vmem:[%s930_s1] sm:$0xff]   ;;  %v47_v7 = vld [vmem:[%s931_s2 + $0x10] sm:$0xff]  ;;  %vm99_vm2 = vcmask 244736   ;;  %v735_v8 = vmov 0   ;;  %v46_v9 = vld [vmem:[%s931_s2 + $0x8] sm:$0xff] }
   0x5   :  { %631 = vmatpush3.bf16.msra.mxu0 %v696_v1  ;;  %v45_v6 = vld [vmem:[%s931_s2] sm:$0xff]  ;;  %694 = vset.pattern.permute.xlu0 %v735_v8  ;;  %v48_v10 = vld [vmem:[%s931_s2 + $0x18] sm:$0xff]  ;;  %v699_v11 = vld [vmem:[%s930_s1 + $0x8] sm:$0xff]  }
   0x6   :  { %632 = vmatprep.subr.bf16.mxu0 %v733_v2  ;;  %52 = vperm.xlu0 %694, %v45_v6   ;;  %v49_v12 = vld [vmem:[%s931_s2 + $0x20] sm:$0xff]  ;;  %v185_v14 = vld [vmem:[%s933_s4 + $0x8] sm:$0xff]  ;;  %v186_v15 = vld [vmem:[%s933_s4 + $0x10] sm:$0xff] }
   0x7   :  { %695 = vset.pattern.permute.xlu1 %v735_v8  ;;  %v184_v13 = vld [vmem:[%s933_s4] sm:$0xff] }
   0x8   :  { %62 = vperm.xlu1 %695, %v47_v7  }
   0x9   :  { %633 = vmatpush3.bf16.msra.mxu0 %v111_v4 }
   0xa   :  { %676 = vmatprep.subr.bf16.mxu0 %v733_v2  ;;  %57 = vperm.xlu0 %694, %v46_v9  }
   0xc   :  { %635 = vmatmul.mubr.msk.bf16.vlgmr.msra.gmra.mrb[0].mxu0 %vm99_vm2, %v698_v5  ;;  %67 = vperm.xlu1 %695, %v48_v10  }
   0xd   :  { %638 = vmatprep.mubr.msk.bf16.mxu0 %vm734_vm1, %v733_v2 }
   0xe   :  { %72 = vperm.xlu0 %694, %v49_v12  }
  0x10   :  { %193 = vperm.xlu1 %695, %v184_v13  }
  0x14   :  { %639 = vmatmul.mubr.msk.bf16.gmra.mrb[4].mxu0 %vm99_vm2, %v699_v11 }
  0x15   :  { %16 = vsyncpa [#allocation4], 0  ;;  %642 = vmatprep.mubr.msk.bf16.mxu0 %vm734_vm1, %v733_v2  ;;  %198 = vperm.xlu0 %694, %v185_v14   ;;  %v187_v16 = vld [vmem:[%s933_s4 + $0x18] sm:$0xff]  ;;  %v700_v17 = vld [vmem:[%s930_s1 + $0x10] ss:$0 sps:$4 sm:$0xff]   ;;  %vm244_vm3 = vcmask 326656  }
  0x16   :  { %203 = vperm.xlu1 %695, %v186_v15   ;;  %v188_v18 = vld [vmem:[%s933_s4 + $0x20] sm:$0xff]  ;;  %v189_v19 = vld [vmem:[%s933_s4 + $0x28] sm:$0xff]  ;;  %v190_v20 = vld [vmem:[%s933_s4 + $0x30] sm:$0x3]  ;;  %vm257_vm4 = vcmask 1043456   ;;  %vm412_vm5 = vcmask 408576  }
  0x17   :  { %v344_v21 = vld [vmem:[%s935_s6] sm:$0xff]  ;;  %v345_v22 = vld [vmem:[%s935_s6 + $0x8] sm:$0xff]  ;;  %v346_v23 = vld [vmem:[%s935_s6 + $0x10] sm:$0xff]  ;;  %vm425_vm6 = vcmask 1040384   ;;  %vm521_vm7 = vcmask 1045504   ;;  %vm517_vm8 = vcmask 490496  }
  0x18   :  { %v347_v24 = vld [vmem:[%s935_s6 + $0x18] sm:$0xff]  ;;  %v348_v25 = vld [vmem:[%s935_s6 + $0x20] sm:$0xff]  ;;  %v349_v26 = vld [vmem:[%s935_s6 + $0x28] sm:$0xff]  ;;  %s736_s23 = smov [#allocation3]  }
  0x19   :  { %208 = vperm.xlu0 %694, %v187_v16   ;;  %v350_v27 = vld [vmem:[%s935_s6 + $0x30] sm:$0xff]  ;;  %v351_v28 = vld [vmem:[%s935_s6 + $0x38] sm:$0xf]  ;;  %v507_v29 = vld [vmem:[#allocation2] sm:$0x1]  ;;  %s572_s4 = sshll.u32 %s736_s23, 4  ;;  %s573_s4 = int_to_ptr.vmem [resolvable:$true] %s572_s4 }
  0x1a   :  { %213 = vperm.xlu1 %695, %v188_v18   ;;  %v701_v30 = vld [vmem:[%s932_s3] sm:$0xff]   ;;  %v702_v62 = vld [vmem:[%s932_s3 + $0x8] sm:$0xff]   ;;  %v703_v63 = vld [vmem:[%s932_s3 + $0x10] sm:$0xff]   ;;  %s709_s24 = scalar_lea.vmem %s573_s4, 16  ;;  %s713_s25 = scalar_lea.vmem %s573_s4, 32 }
  0x1b   :  { %652 = vmatprep.mubr.msk.bf16.mxu1 %vm244_vm3, %v701_v30  ;;  %v704_v0 = vld [vmem:[%s932_s3 + $0x18] ss:$0 sps:$4 sm:$0x11]   ;;  %v705_v1 = vld [vmem:[%s934_s5] sm:$0xff]   ;;  %p710_p0 = scmp.ne.s32.totalorder %s573_s4, %s709_s24  ;;  %p714_p1 = scmp.lt.s32.totalorder %s573_s4, %s573_s4 }
  0x1c   :  { %643 = vmatmul.mubr.msk.bf16.gmra.mrb[8].mxu0 %vm99_vm2, %v700_v17  ;;  %p715_p2 = scmp.lt.s32.totalorder %s713_s25, %s709_s24 }
  0x1d   :  { %684 = vmatprep.mubr.msk.bf16.mxu0 %vm734_vm1, %v733_v2  ;;  %218 = vperm.xlu0 %694, %v189_v19  }
  0x1e   :  { %223 = vperm.xlu1 %695, %v190_v20   ;;  %p716_p3 = por %p715_p2, %p714_p1 }
  0x20   :  { %p717_p4 = pnand %p716_p3, %p710_p0 }
  0x21   :  { %354 = vperm.xlu0 %694, %v344_v21  }
  0x22   :  { %359 = vperm.xlu1 %695, %v345_v22  }
  0x25   :  { %364 = vperm.xlu0 %694, %v346_v23  }
  0x26   :  { %369 = vperm.xlu1 %695, %v347_v24  }
  0x29   :  { %374 = vperm.xlu0 %694, %v348_v25  }
  0x2a   :  { %379 = vperm.xlu1 %695, %v349_v26  }
  0x2d   :  { %384 = vperm.xlu0 %694, %v350_v27  }
  0x2e   :  { %389 = vperm.xlu1 %695, %v351_v28  }
  0x31   :  { %510 = vperm.xlu0 %694, %v507_v29  }
  0x85   :  { %v53_v31 = vpop.permute.xlu0 %52 }
  0x87   :  { %v63_v39 = vpop.permute.xlu1 %62 }
  0x89   :  { %v58_v35 = vpop.permute.xlu0 %57 }
  0x8b   :  { %v68_v46 = vpop.permute.xlu1 %67 }
  0x8d   :  { %v73_v53 = vpop.permute.xlu0 %72 }
  0x8f   :  { %v194_v3 = vpop.permute.xlu1 %193 }
  0x94   :  { %v199_v4 = vpop.permute.xlu0 %198 }
  0x95   :  { %v204_v5 = vpop.permute.xlu1 %203 }
  0x98   :  { %v209_v9 = vpop.permute.xlu0 %208 }
  0x99   :  { %v214_v12 = vpop.permute.xlu1 %213 }
  0x9c   :  { %v219_v28 = vpop.permute.xlu0 %218 }
  0x9d   :  { %v224_v23 = vpop.permute.xlu1 %223 }
  0xdf   :  { %v147_v32 = vpop.f32.mrb[0].mxu0 }
  0xe0   :  { %v148_v33 = vadd.f32 %v147_v32, %v53_v31  ;;  %v636_v34 = vpop.f32.mrb[1].mxu0 }
  0xe1   :  { %v150_v36 = vpop.f32.mrb[2].mxu0 }
  0xe2   :  { %v151_v37 = vadd.f32 %v150_v36, %v58_v35  ;;  %v637_v38 = vpop.f32.mrb[3].mxu0  ;;  %v169_v40 = vmax.f32 %v148_v33, 0.0 }
  0xe3   :  { %v707_v38 = vld [vmem:[%s934_s5 + $0x10] sm:$0xff]  }
  0xe4   :  { %v170_v41 = vmax.f32 %v151_v37, 0.0  ;;  %v706_v37 = vld [vmem:[%s934_s5 + $0x8] sm:$0xff]  }
  0xe6   :  { %v181_v42 = vpack.c.bf16 %v170_v41, %v169_v40  ;;  %v355_v40 = vpop.permute.xlu0 %354  ;;  %v360_v41 = vpop.permute.xlu1 %359 }
  0xe7   :  { %v155_v43 = vpop.f32.mrb[4].mxu0 }
  0xe8   :  { %v156_v44 = vadd.f32 %v155_v43, %v63_v39  ;;  %v640_v45 = vpop.f32.mrb[5].mxu0  ;;  %646 = vmatprep.subr.bf16.mxu1 %v181_v42  ;;  %v708_v39 = vld [vmem:[%s934_s5 + $0x18] sm:$0x3f]  }
  0xe9   :  { %v158_v47 = vpop.f32.mrb[6].mxu0  ;;  %647 = vmatpush3.bf16.msra.mxu1 %v181_v42 }
  0xea   :  { %v159_v48 = vadd.f32 %v158_v47, %v68_v46  ;;  %v641_v49 = vpop.f32.mrb[7].mxu0  ;;  %v171_v50 = vmax.f32 %v156_v44, 0.0  ;;  %v365_v42 = vpop.permute.xlu0 %364 }
  0xeb   :  { %v370_v43 = vpop.permute.xlu1 %369 }
  0xec   :  { %v172_v51 = vmax.f32 %v159_v48, 0.0 }
  0xee   :  { %v182_v52 = vpack.c.bf16 %v172_v51, %v171_v50  ;;  %v375_v47 = vpop.permute.xlu0 %374 }
  0xef   :  { %v163_v54 = vpop.f32.mrb[8].mxu0 }
  0xf0   :  { %v164_v55 = vadd.f32 %v163_v54, %v73_v53  ;;  %v644_v56 = vpop.f32.mrb[9].mxu0  ;;  %648 = vmatprep.subr.bf16.mxu1 %v182_v52 }
  0xf1   :  { %v166_v57 = vpop.f32.mrb[10].mxu0  ;;  %649 = vmatpush3.bf16.msra.mxu1 %v182_v52  ;;  %v380_v52 = vpop.permute.xlu1 %379 }
  0xf2   :  { %v173_v58 = vmax.f32 %v164_v55, 0.0  ;;  %v645_v59 = vpop.f32.mrb[11].mxu0 }
  0xf3   :  { %v385_v59 = vpop.permute.xlu0 %384 }
  0xf4   :  { %v183_v60 = vpack.c.bf16 %v173_v58, %v173_v58 }
  0xf6   :  { %688 = vmatprep.subr.msk.bf16.mxu1 %vm257_vm4, %v183_v60  ;;  %v259_v61 = vsel %vm257_vm4, %v183_v60, 0 }
  0xf7   :  { %651 = vmatpush3.bf16.msra.mxu1 %v259_v61 }
  0xfa   :  { %653 = vmatmul.mubr.msk.bf16.vlgmr.msra.gmra.mrb[0].mxu1 %vm244_vm3, %v702_v62 }
  0xfb   :  { %656 = vmatprep.mubr.msk.bf16.mxu1 %vm244_vm3, %v703_v63 }
 0x102   :  { %657 = vmatmul.mubr.msk.bf16.gmra.mrb[4].mxu1 %vm244_vm3, %v704_v0  ;;  %v390_v0 = vpop.permute.xlu1 %389 }
 0x103   :  { %668 = vmatprep.mubr.msk.bf16.mxu1 %vm412_vm5, %v705_v1 }
 0x1cd   :  { %v654_v6 = vpop.f32.mrb[0].mxu1 }
 0x1ce   :  { %v304_v7 = vadd.f32 %v654_v6, %v204_v5  ;;  %v295_v8 = vpop.f32.mrb[1].mxu1 }
 0x1cf   :  { %v296_v10 = vadd.f32 %v295_v8, %v194_v3  ;;  %v655_v11 = vpop.f32.mrb[2].mxu1 }
 0x1d0   :  { %v307_v13 = vadd.f32 %v655_v11, %v209_v9  ;;  %v298_v14 = vpop.f32.mrb[3].mxu1  ;;  %v327_v16 = vmax.f32 %v304_v7, 0.0 }
 0x1d1   :  { %v299_v15 = vadd.f32 %v298_v14, %v199_v4  ;;  %v325_v18 = vmax.f32 %v296_v10, 0.0  ;;  %v502_v14 = vld [vmem:[%s936_s7] sm:$0x1] }
 0x1d2   :  { %v328_v17 = vmax.f32 %v307_v13, 0.0 }
 0x1d3   :  { %v326_v19 = vmax.f32 %v299_v15, 0.0  ;;  %v513_v15 = vlaneseq }
 0x1d4   :  { %v341_v20 = vpack.c.bf16 %v328_v17, %v327_v16 }
 0x1d5   :  { %v340_v21 = vpack.c.bf16 %v326_v19, %v325_v18  ;;  %v658_v22 = vpop.f32.mrb[4].mxu1  ;;  %v514_v16 = vshrl.u32 %v513_v15, 7  ;;  %v511_v18 = vpop.permute.xlu0 %510 }
 0x1d6   :  { %v311_v24 = vpop.f32.mrb[5].mxu1  ;;  %v320_v25 = vadd.f32 %v658_v22, %v224_v23 }
 0x1d7   :  { %v312_v26 = vadd.f32 %v311_v24, %v214_v12  ;;  %v659_v27 = vpop.f32.mrb[6].mxu1  ;;  %660 = vmatprep.subr.bf16.mxu1 %v340_v21  ;;  %v515_v17 = vsub.s32 0, %v514_v16 }
 0x1d8   :  { %v314_v29 = vpop.f32.mrb[7].mxu1  ;;  %661 = vmatpush3.bf16.msra.mxu1 %v340_v21  ;;  %v331_v31 = vmax.f32 %v320_v25, 0.0 }
 0x1d9   :  { %v315_v30 = vadd.f32 %v314_v29, %v219_v28  ;;  %662 = vmatprep.subr.bf16.mxu1 %v341_v20  ;;  %v329_v32 = vmax.f32 %v312_v26, 0.0  ;;  %v516_v19 = vrot.slane %v511_v18, %v515_v17 }
 0x1da   :  { %v343_v35 = vpack.c.bf16 %v331_v31, %v331_v31 }
 0x1db   :  { %v330_v33 = vmax.f32 %v315_v30, 0.0 }
 0x1dc   :  { %663 = vmatpush3.bf16.msra.mxu1 %v341_v20  ;;  %v427_v36 = vsel %vm425_vm6, %v343_v35, 0 }
 0x1dd   :  { %v342_v34 = vpack.c.bf16 %v330_v33, %v329_v32 }
 0x1df   :  { %664 = vmatprep.subr.bf16.mxu1 %v342_v34 }
 0x1e0   :  { %665 = vmatpush3.bf16.msra.mxu1 %v342_v34 }
 0x1e1   :  { %689 = vmatprep.subr.msk.bf16.mxu1 %vm425_vm6, %v343_v35 }
 0x1e4   :  { %667 = vmatpush3.bf16.msra.mxu1 %v427_v36 }
 0x1e7   :  { %669 = vmatmul.mubr.msk.bf16.vlgmr.msra.gmra.mrb[8].mxu1 %vm412_vm5, %v706_v37 }
 0x1e8   :  { %672 = vmatprep.mubr.msk.bf16.mxu1 %vm412_vm5, %v707_v38 }
 0x1ef   :  { %673 = vmatmul.mubr.msk.bf16.gmra.mrb[12].mxu1 %vm412_vm5, %v708_v39 }
 0x2ba   :  { %v670_v44 = vpop.f32.mrb[8].mxu1 }
 0x2bb   :  { %v472_v45 = vadd.f32 %v670_v44, %v365_v42  ;;  %v463_v46 = vpop.f32.mrb[9].mxu1 }
 0x2bc   :  { %v464_v48 = vadd.f32 %v463_v46, %v355_v40  ;;  %v671_v49 = vpop.f32.mrb[10].mxu1 }
 0x2bd   :  { %v475_v50 = vadd.f32 %v671_v49, %v370_v43  ;;  %v466_v51 = vpop.f32.mrb[11].mxu1  ;;  %v496_v54 = vmax.f32 %v472_v45, 0.0 }
 0x2be   :  { %v467_v53 = vadd.f32 %v466_v51, %v360_v41  ;;  %v494_v56 = vmax.f32 %v464_v48, 0.0 }
 0x2bf   :  { %v497_v55 = vmax.f32 %v475_v50, 0.0 }
 0x2c0   :  { %v495_v57 = vmax.f32 %v467_v53, 0.0 }
 0x2c1   :  { %v504_v58 = vpack.c.bf16 %v497_v55, %v496_v54 }
 0x2c2   :  { %v503_v60 = vpack.c.bf16 %v495_v57, %v494_v56  ;;  %v674_v61 = vpop.f32.mrb[12].mxu1 }
 0x2c3   :  { %v488_v62 = vadd.f32 %v674_v61, %v385_v59  ;;  %v479_v63 = vpop.f32.mrb[13].mxu1 }
 0x2c4   :  { %v480_v1 = vadd.f32 %v479_v63, %v375_v47  ;;  %v675_v3 = vpop.f32.mrb[14].mxu1  ;;  %677 = vmatpush3.bf16.msra.mxu0 %v503_v60 }
 0x2c5   :  { %v491_v4 = vadd.f32 %v675_v3, %v390_v0  ;;  %v482_v5 = vpop.f32.mrb[15].mxu1  ;;  %678 = vmatprep.subr.bf16.mxu0 %v733_v2  ;;  %v500_v7 = vmax.f32 %v488_v62, 0.0 }
 0x2c6   :  { %v483_v6 = vadd.f32 %v482_v5, %v380_v52  ;;  %v498_v9 = vmax.f32 %v480_v1, 0.0 }
 0x2c7   :  { %v501_v8 = vmax.f32 %v491_v4, 0.0 }
 0x2c8   :  { %v499_v10 = vmax.f32 %v483_v6, 0.0  ;;  %679 = vmatpush3.bf16.msra.mxu0 %v504_v58 }
 0x2c9   :  { %v506_v11 = vpack.c.bf16 %v501_v8, %v500_v7  ;;  %680 = vmatprep.subr.bf16.mxu0 %v733_v2 }
 0x2ca   :  { %v505_v12 = vpack.c.bf16 %v499_v10, %v498_v9 }
 0x2cb   :  { %v523_v13 = vsel %vm521_vm7, %v506_v11, 0 }
 0x2cc   :  { %681 = vmatpush3.bf16.msra.mxu0 %v505_v12 }
 0x2cd   :  { %682 = vmatprep.subr.bf16.mxu0 %v733_v2 }
 0x2d0   :  { %683 = vmatpush3.bf16.msra.mxu0 %v523_v13 }
 0x2d3   :  { %685 = vmatmul.mubr.msk.bf16.vlgmr.msra.gmra.mrb[12].mxu0 %vm517_vm8, %v502_v14 }
 0x3a6   :  { %v559_v20 = vpop.f32.mrb[12].mxu0 }
 0x3a7   :  { %v560_v21 = vadd.f32 %v559_v20, %v516_v19  ;;  %v686_v22 = vpop.f32.mrb[13].mxu0 }
 0x3a8   :  { %v562_v2 = vpop.f32.mrb[14].mxu0 }
 0x3a9   :  { %565 = vst [vmem:[#allocation3] sm:$0x1] %v560_v21  ;;  %v687_v23 = vpop.f32.mrb[15].mxu0 }
 0x3aa   :  { %720 = shalt.err (!%p717_p4)
}
 0x3ab   :  { %s721_s27 = scalar_lea.hbm %s938_s9, 16 }
 0x3ac   :  { %p722_p5 = scmp.ne.s32.totalorder %s938_s9, %s721_s27  ;;  %p725_p6 = scmp.lt.u32.totalorder %s721_s27, %s938_s9 }
 0x3ae   :  { %p727_p7 = pnand %p725_p6, %p722_p5 }
 0x3b0   :  { %730 = shalt.err (!%p727_p7)
}
 0x3b1   :  { %575 = dma.vmem_to_hbm [thread:$0]  %s573_s4, 16, %s938_s9, [#allocation4]  }
 0x3b2   :  { %731 = dma.done.wait [#allocation4], 16  }
 0x3b3   :  { %732 = vsyncadd [#allocation4], 4294967280 }
 0x3b4   :  { %579 = vsyncpa [#allocation4], 1 }

</bundles_post_ra>
